<compile_context>
chip_gen: v7x
topology: tpu7x:2x2x1
jax: 0.10.0
libtpu: 0.0.40
codegen_flags: <defaults>
</compile_context>

<pallas_src>
import jax
import jax.numpy as jnp
from jax.experimental import pallas as pl
from jax.experimental.pallas import tpu as pltpu

LANE = 128
MAX_TM = 1024                    # A row-block height cap (works on v5e/v6e/v7x)
MAX_NK = 2048                    # A reduction-block width cap
VMEM_LIMIT = 32 * 1024 * 1024    # safe on v7x (64 MiB physical VMEM) and larger parts
VMEM_BUDGET = 24 * 1024 * 1024   # headroom target for the pipeline working set


def _round_up(n, m):
    return ((n + m - 1) // m) * m


def _pow2_tile(n_pad, cap):
    """Largest power-of-two multiple of 128 that is <= min(cap, n_pad)."""
    t = LANE
    while t * 2 <= min(cap, n_pad):
        t *= 2
    return t


def _working_set_bytes(tm, nk, cp_out):
    a = 2 * tm * nk * 2              # A block, bf16, double buffered
    xwl = 2 * nk * cp_out * 2        # (x @ W_l) K block, bf16, double buffered
    root = 2 * tm * cp_out * 4       # root tile, f32, double buffered
    out = 2 * tm * cp_out * 2        # output tile, bf16, double buffered
    acc = tm * cp_out * 4            # f32 accumulator scratch
    return a + xwl + root + out + acc


def _pick_tiles(n, cp_out):
    """Pick (n_pad, tm, nk): big power-of-two tiles, pad N up to a tile multiple."""
    np128 = _round_up(max(n, 1), LANE)
    tm = _pow2_tile(np128, MAX_TM)
    nk = _pow2_tile(np128, MAX_NK)
    while _working_set_bytes(tm, nk, cp_out) > VMEM_BUDGET and (tm > LANE or nk > LANE):
        if nk >= tm and nk > LANE:
            nk //= 2
        else:
            tm //= 2
    n_pad = _round_up(np128, max(tm, nk))   # zero rows/cols are harmless (see forward())
    # v7x megacore: prefer >= 2 row blocks so the parallel axis splits across both TCs.
    if n_pad // tm < 2 and tm > LANE:
        tm //= 2
    return n_pad, tm, nk


def _agg_bias_relu_kernel(a_ref, xwl_ref, root_ref, o_ref, acc_ref):
    # a_ref:    (tm, nk)      bf16  row x K block of the row-normalized adjacency
    # xwl_ref:  (nk, cp_out)  bf16  K block of (x @ W_l)   (aggregation operand)
    # root_ref: (tm, cp_out)  f32   x @ W_r + b for the row-block nodes
    # o_ref:    (tm, cp_out)  bf16  output tile (lane dense)
    # acc_ref:  (tm, cp_out)  f32   VMEM accumulator for A @ (x @ W_l)
    k = pl.program_id(1)

    @pl.when(k == 0)
    def _init():
        acc_ref[...] = jnp.zeros_like(acc_ref)

    acc_ref[...] += jnp.dot(a_ref[...], xwl_ref[...],
                            preferred_element_type=jnp.float32)

    @pl.when(k == pl.num_programs(1) - 1)
    def _epilogue():
        o_ref[...] = jnp.maximum(acc_ref[...] + root_ref[...], 0.0).astype(o_ref.dtype)


def aggregate_bias_relu(a_bf16, xwl_bf16, root_f32, *, tm, nk, out_dtype=jnp.bfloat16):
    """relu(A @ xwl + root), K-tiled over the node dimension."""
    n_pad = a_bf16.shape[0]
    cp_out = xwl_bf16.shape[1]
    assert a_bf16.shape == (n_pad, n_pad)
    assert xwl_bf16.shape == (n_pad, cp_out) and root_f32.shape == (n_pad, cp_out)
    assert n_pad % tm == 0 and n_pad % nk == 0 and cp_out % LANE == 0
    grid = (n_pad // tm, n_pad // nk)
    return pl.pallas_call(
        _agg_bias_relu_kernel,
        out_shape=jax.ShapeDtypeStruct((n_pad, cp_out), out_dtype),
        grid_spec=pltpu.PrefetchScalarGridSpec(
            num_scalar_prefetch=0,
            grid=grid,
            in_specs=[
                pl.BlockSpec((tm, nk), lambda i, k: (i, k)),        # A row/K block
                pl.BlockSpec((nk, cp_out), lambda i, k: (k, 0)),    # (x @ W_l) K block
                pl.BlockSpec((tm, cp_out), lambda i, k: (i, 0)),    # root tile (per row block)
            ],
            out_specs=pl.BlockSpec((tm, cp_out), lambda i, k: (i, 0)),
            scratch_shapes=[pltpu.VMEM((tm, cp_out), jnp.float32)],
        ),
        compiler_params=pltpu.CompilerParams(
            dimension_semantics=("parallel", "arbitrary"),
            vmem_limit_bytes=VMEM_LIMIT,
        ),
    )(a_bf16, xwl_bf16, root_f32)


class SAGEMgaeV2Pallas:
    """JAX/Pallas port of SAGE_mgaev2.forward (inference)."""

    def __init__(self, in_channels, hidden_channels, out_channels, num_layers,
                 dropout, key):
        self.dropout = dropout  # TODO(synk): dropout is identity here (training=False).
        self.dims = [in_channels] + [hidden_channels] * (num_layers - 1) + [out_channels]
        self.params = []         # unpadded weights (for the pure-JAX reference)
        self.params_padded = []  # 128-lane zero-padded weights (for the kernel path)
        for li in range(num_layers):
            c_in, c_out = self.dims[li], self.dims[li + 1]
            cp_in, cp_out = _round_up(c_in, LANE), _round_up(c_out, LANE)
            key, k1, k2, k3 = jax.random.split(key, 4)
            scale = 1.0 / jnp.sqrt(jnp.float32(c_in))
            # lin_l: Linear(c_in, c_out, bias=True)  -> stored as [c_in, c_out]
            w_l = jax.random.normal(k1, (c_in, c_out), jnp.float32) * scale
            # lin_r: Linear(c_in, c_out, bias=False)
            w_r = jax.random.normal(k2, (c_in, c_out), jnp.float32) * scale
            b = jax.random.normal(k3, (1, c_out), jnp.float32) * scale
            w_l_p = jnp.zeros((cp_in, cp_out), jnp.float32).at[:c_in, :c_out].set(w_l)
            w_r_p = jnp.zeros((cp_in, cp_out), jnp.float32).at[:c_in, :c_out].set(w_r)
            b_p = jnp.zeros((1, cp_out), jnp.float32).at[:, :c_out].set(b)
            self.params.append((w_l, w_r, b))
            self.params_padded.append((w_l_p, w_r_p, b_p))

    def forward(self, x, a_norm):
        N, c0 = x.shape
        cp0 = _round_up(c0, LANE)
        cp_max = max(_round_up(d, LANE) for d in self.dims[1:])
        n_pad, tm, nk = _pick_tiles(N, cp_max)

        # Pad node + channel dims with zeros; cast A once to bf16 for the MXU stream.
        a_p = jnp.zeros((n_pad, n_pad), jnp.bfloat16).at[:N, :N].set(
            a_norm.astype(jnp.bfloat16))
        h = jnp.zeros((n_pad, cp0), jnp.float32).at[:N, :c0].set(x)

        # NOTE: after each layer the padded node rows of h hold relu(b) != 0.  This is
        # harmless: A's padded columns are zero (so they never feed real rows) and all
        # returned outputs are sliced to [:N, :c_out].
        xx = []
        for li, (w_l_p, w_r_p, b_p) in enumerate(self.params_padded):
            # Reassociated prologue (plain XLA, small relative to the N x N aggregation):
            xwl = (h @ w_l_p).astype(jnp.bfloat16)        # aggregation operand, bf16
            root = h @ w_r_p + b_p                        # root term + bias, f32
            h_bf = aggregate_bias_relu(a_p, xwl, root, tm=tm, nk=nk)   # padded bf16
            xx.append(h_bf[:N, :self.dims[li + 1]])
            h = h_bf.astype(jnp.float32)
        return xx


def build_row_normalized_adjacency(key, num_nodes, avg_degree=8):
    """Dense random adjacency, row-normalized for mean aggregation."""
    p = avg_degree / num_nodes
    adj = (jax.random.uniform(key, (num_nodes, num_nodes)) < p).astype(jnp.float32)
    adj = adj * (1.0 - jnp.eye(num_nodes, dtype=jnp.float32))   # no self loops
    deg = jnp.sum(adj, axis=1, keepdims=True)
    inv_deg = jnp.where(deg > 0, 1.0 / deg, 0.0)                # isolated nodes -> 0
    return adj * inv_deg


def reference_forward(model, x, a_norm):
    """Pure-JAX reference mirroring the kernel path's quantization (bf16 A and x@W_l)."""
    a = a_norm.astype(jnp.bfloat16).astype(jnp.float32)
    h = x.astype(jnp.float32)
    xx = []
    for (w_l, w_r, b) in model.params:
        xwl = (h @ w_l).astype(jnp.bfloat16).astype(jnp.float32)
        root = h @ w_r + b
        out = a @ xwl + root
        h_bf = jnp.maximum(out, 0.0).astype(jnp.bfloat16)
        xx.append(h_bf)
        h = h_bf.astype(jnp.float32)
    return xx


if __name__ == "__main__":
    key = jax.random.PRNGKey(0)
    k_feat, k_adj, k_param = jax.random.split(key, 3)

    N = 300              # not a multiple of 128 -> exercises node-dim padding
    in_channels = 32
    hidden_channels = 64
    out_channels = 32
    num_layers = 3
    dropout = 0.5        # inactive at inference

    x = jax.random.normal(k_feat, (N, in_channels), jnp.float32)
    a_norm = build_row_normalized_adjacency(k_adj, N)

    model = SAGEMgaeV2Pallas(in_channels, hidden_channels, out_channels,
                             num_layers, dropout, k_param)

    outs = model.forward(x, a_norm)
    outs = [jax.block_until_ready(o) for o in outs]

    # correctness check against the pure-JAX reference
    refs = reference_forward(model, x, a_norm)
    for o, r in zip(outs, refs):
        assert o.shape == r.shape, (o.shape, r.shape)
        err = jnp.max(jnp.abs(o.astype(jnp.float32) - r.astype(jnp.float32)))
        assert err < 5e-2, f"mismatch vs reference: {err}"

    print("KERNEL_OK")
</pallas_src>

<mosaic_0001>
module attributes {stable_mosaic.version = 11 : i64} {
  func.func @_agg_bias_relu_kernel(%arg0: i32, %arg1: i32, %arg2: memref<256x256xbf16, #tpu.memory_space<vmem>>, %arg3: memref<256x128xbf16, #tpu.memory_space<vmem>>, %arg4: memref<256x128xf32, #tpu.memory_space<vmem>>, %arg5: memref<256x128xbf16, #tpu.memory_space<vmem>>, %arg6: memref<256x128xf32, #tpu.memory_space<vmem>>) attributes {dimension_semantics = [#tpu.dimension_semantics<parallel>, #tpu.dimension_semantics<arbitrary>], iteration_bounds = array<i64: 2, 2>, scalar_prefetch = 0 : i64, scratch_operands = 1 : i64, tpu.core_type = #tpu.core_type<tc>, window_params = [{transform_indices = @transform_0, window_bounds = array<i64: 256, 256>}, {transform_indices = @transform_1, window_bounds = array<i64: 256, 128>}, {transform_indices = @transform_2, window_bounds = array<i64: 256, 128>}, {transform_indices = @transform_3, window_bounds = array<i64: 256, 128>}]} {
    %c0_i32 = arith.constant 0 : i32
    %0 = arith.cmpi eq, %arg1, %c0_i32 : i32
    %1 = arith.extui %0 : i1 to i32
    %c0_i32_0 = arith.constant 0 : i32
    %2 = arith.cmpi ne, %1, %c0_i32_0 : i32
    scf.if %2 {
      %cst_9 = arith.constant 0.000000e+00 : f32
      %12 = vector.broadcast %cst_9 : f32 to vector<256x128xf32>
      %c0_10 = arith.constant 0 : index
      %c0_11 = arith.constant 0 : index
      %13 = vector.load %arg6[%c0_10, %c0_11] : memref<256x128xf32, #tpu.memory_space<vmem>>, vector<256x128xf32>
      tpu.vector_store %arg6[%c0_10, %c0_11], %12 {strides = array<i32>} : memref<256x128xf32, #tpu.memory_space<vmem>>, vector<256x128xf32>,
    } else {
    }
    %c0 = arith.constant 0 : index
    %c0_1 = arith.constant 0 : index
    %3 = vector.load %arg6[%c0, %c0_1] : memref<256x128xf32, #tpu.memory_space<vmem>>, vector<256x128xf32>
    %c0_2 = arith.constant 0 : index
    %c0_3 = arith.constant 0 : index
    %4 = vector.load %arg2[%c0_2, %c0_3] : memref<256x256xbf16, #tpu.memory_space<vmem>>, vector<256x256xbf16>
    %c0_4 = arith.constant 0 : index
    %c0_5 = arith.constant 0 : index
    %5 = vector.load %arg3[%c0_4, %c0_5] : memref<256x128xbf16, #tpu.memory_space<vmem>>, vector<256x128xbf16>
    %cst = arith.constant dense<0.000000e+00> : vector<256x128xf32>
    %6 = tpu.matmul %4, %5, %cst {dimension_numbers = #tpu.dot_dimension_numbers<[1], [0], [0], [1], [0, 0, 1, 1], [], []>} : vector<256x256xbf16>, vector<256x128xbf16>, vector<256x128xf32> -> vector<256x128xf32>
    %7 = arith.addf %3, %6 : vector<256x128xf32>
    %c0_6 = arith.constant 0 : index
    %c0_7 = arith.constant 0 : index
    %8 = vector.load %arg6[%c0_6, %c0_7] : memref<256x128xf32, #tpu.memory_space<vmem>>, vector<256x128xf32>
    tpu.vector_store %arg6[%c0_6, %c0_7], %7 {strides = array<i32>} : memref<256x128xf32, #tpu.memory_space<vmem>>, vector<256x128xf32>,
    %c1_i32 = arith.constant 1 : i32
    %9 = arith.cmpi eq, %arg1, %c1_i32 : i32
    %10 = arith.extui %9 : i1 to i32
    %c0_i32_8 = arith.constant 0 : i32
    %11 = arith.cmpi ne, %10, %c0_i32_8 : i32
    scf.if %11 {
      %c0_9 = arith.constant 0 : index
      %c0_10 = arith.constant 0 : index
      %12 = vector.load %arg6[%c0_9, %c0_10] : memref<256x128xf32, #tpu.memory_space<vmem>>, vector<256x128xf32>
      %c0_11 = arith.constant 0 : index
      %c0_12 = arith.constant 0 : index
      %13 = vector.load %arg4[%c0_11, %c0_12] : memref<256x128xf32, #tpu.memory_space<vmem>>, vector<256x128xf32>
      %14 = arith.addf %12, %13 : vector<256x128xf32>
      %cst_13 = arith.constant 0.000000e+00 : f32
      %15 = vector.broadcast %cst_13 : f32 to vector<256x128xf32>
      %16 = arith.maximumf %14, %15 : vector<256x128xf32>
      %17 = arith.truncf %16 : vector<256x128xf32> to vector<256x128xbf16>
      %c0_14 = arith.constant 0 : index
      %c0_15 = arith.constant 0 : index
      %18 = vector.load %arg5[%c0_14, %c0_15] : memref<256x128xbf16, #tpu.memory_space<vmem>>, vector<256x128xbf16>
      tpu.vector_store %arg5[%c0_14, %c0_15], %17 {strides = array<i32>} : memref<256x128xbf16, #tpu.memory_space<vmem>>, vector<256x128xbf16>,
    } else {
    }
    return
  }
  func.func @transform_0(%arg0: i32, %arg1: i32) -> (i32, i32) {
    %c0_i32 = arith.constant 0 : i32
    return %arg0, %arg1 : i32, i32
  }
  func.func @transform_1(%arg0: i32, %arg1: i32) -> (i32, i32) {
    %c0_i32 = arith.constant 0 : i32
    %c0_i32_0 = arith.constant 0 : i32
    return %arg1, %c0_i32 : i32, i32
  }
  func.func @transform_2(%arg0: i32, %arg1: i32) -> (i32, i32) {
    %c0_i32 = arith.constant 0 : i32
    %c0_i32_0 = arith.constant 0 : i32
    return %arg0, %c0_i32 : i32, i32
  }
  func.func @transform_3(%arg0: i32, %arg1: i32) -> (i32, i32) {
    %c0_i32 = arith.constant 0 : i32
    %c0_i32_0 = arith.constant 0 : i32
    return %arg0, %c0_i32 : i32, i32
  }
}

</mosaic_0001>

<bundles_post_ra>
// kernel: tpu_custom_call.1
= control target key start
LH: loop header
LB: loop body
LE: loop exit
PB: predicated region body
PF: predicated region fallthrough
CT: control target
= control target key end

     0   :  { %s2720_s0 = inlined_call_operand.hbm [shape: bf16[512,512], index: 0, kind: input, shape index: {}]   ;;  %s2721_s1 = inlined_call_operand.hbm [shape: bf16[512,128], index: 1, kind: input, shape index: {}]   ;;  %s2722_s2 = inlined_call_operand.hbm [shape: f32[512,128], index: 2, kind: input, shape index: {}]   ;;  %s2723_s3 = inlined_call_operand.hbm [shape: bf16[512,128], index: 3, kind: output, shape index: {}]  }
   0x1   :  { %2737 = sst [smem:[#allocation20_spill]] %s2721_s1 }
   0x2   :  { %2738 = sst [smem:[#allocation21_spill]] %s2723_s3 }
   0x3   :  { %8 = vsyncpa [#allocation4], 0 }
   0x4   :  { %10 = vsyncpa [#allocation4 + $0x1], 0 }
   0x5   :  { %11 = vsyncpa [#allocation7], 0 }
   0x6   :  { %13 = vsyncpa [#allocation7 + $0x1], 0 }
   0x7   :  { %14 = vsyncpa [#allocation5], 0 }
   0x8   :  { %16 = vsyncpa [#allocation5 + $0x1], 0  ;;  %s2190_s12 = smov 0   ;;  %s2192_s13 = smov 0  }
   0x9   :  { %s2194_s14 = smov 0   ;;  %s2196_s15 = smov 0  }
   0xa   :  { %s2198_s16 = smov 0   ;;  %s2200_s17 = smov 0  }
   0xb   :  { %s2202_s18 = smov 0   ;;  %s2204_s19 = smov 0  }
   0xc   :  { %s2206_s20 = smov 0   ;;  %s2208_s21 = smov 0  }
   0xd   :  { %s2210_s22 = smov 0   ;;  %s2212_s23 = smov 0  }
   0xe   :  { %s2214_s24 = smov 0   ;;  %s2216_s25 = smov 0  }
   0xf LB: > { %2739 = sst [smem:[#allocation14_spill]] %s2124_s17  ;;  %s2261_s26 = sadd.s32 4294967295, %s2156_s25   ;;  %s2156_s25 = sphi %s2216_s25, %s22_s25   ;;  %s2152_s24 = sphi %s2214_s24, %s2793_s24   ;;  %s2148_s23 = sphi %s2212_s23, %s2792_s23   ;;  %s2144_s22 = sphi %s2210_s22, %s2791_s22   ;;  %s2140_s21 = sphi %s2208_s21, %s2790_s21   ;;  %s2136_s20 = sphi %s2206_s20, %s2789_s20   ;;  %s2132_s19 = sphi %s2204_s19, %s2788_s19   ;;  %s2128_s18 = sphi %s2202_s18, %s2787_s18   ;;  %s2124_s17 = sphi %s2200_s17, %s2778_s17   ;;  %s2120_s16 = sphi %s2198_s16, %s2786_s16   ;;  %s2116_s15 = sphi %s2196_s15, %s2785_s15   ;;  %s2112_s14 = sphi %s2194_s14, %s2784_s14   ;;  %s2108_s13 = sphi %s2192_s13, %s2783_s13   ;;  %s2104_s12 = sphi %s2190_s12, %s2782_s12  }
  0x10   : > { %2740 = sst [smem:[#allocation15_spill]] %s2144_s22  ;;  %s31_s27 = sadd.s32 1, %s2148_s23 }
  0x11   : > { %p32_p0 = scmp.ge.s32.totalorder %s31_s27, 2  ;;  %s34_s28 = sadd.s32 1, %s2152_s24 }
  0x12   : > { %p2729_p1 = scmp.eq.s32.totalorder %s2156_s25, 0  ;;  %p2728_p2 = scmp.eq.s32.totalorder %s2261_s26, 0 }
  0x13   : > { %s2795_s27 = smov (%p32_p0, %s31_s27), 0  ;;  %s2797_s28 = smov (!%p32_p0, %s34_s28), %s2152_s24 }
  0x14   : > { %2741 = sst [smem:[#allocation16_spill]] %s2795_s27  ;;  %s39_s29 = ssub.s32 %s2148_s23, %s2795_s27 }
  0x15   : > { %s69_s30 = sadd.s32 1, %s2124_s17  ;;  %p36_p3 = scmp.ge.s32.totalorder %s2797_s28, 2 }
  0x16   : > { %p67_p4 = scmp.eq.s32.totalorder %s39_s29, 0  ;;  %p76_p5 = scmp.ne.s32.totalorder %s2124_s17, %s2120_s16 }
  0x17   : > { %p82_p6 = scmp.ne.s32.totalorder %s2120_s16, %s2116_s15  ;;  %s2799_s28 = smov (%p36_p3, %s2797_s28), 0 }
  0x18   : > { %2742 = sst [smem:[#allocation17_spill]] %s2799_s28  ;;  %s2284_s5 = ssub.s32 %s2152_s24, %s2799_s28 }
  0x19   : > { %s2280_s4 = scalar_select %p67_p4, %s2124_s17, %s69_s30  }
  0x1a   : > { %p2288_p7 = por %p76_p5, %p2729_p1  ;;  %s40_s7 = sor.u32 %s39_s29, %s2284_s5 }
  0x1b   : > { %2743 = sst [smem:[#allocation18_spill]] %s2280_s4  ;;  %p2295_p8 = por %p82_p6, %p2728_p2 }
  0x1c   : > { %p2299_p9 = scmp.eq.s32.totalorder %s40_s7, 0  ;;  %p2727_p11 = scmp.lt.s32.totalorder %s2156_s25, 4 }
  0x1d   : > { %s2745_s8 = scalar_select %p2295_p8, 1, 0 }
  0x1e   : > { %s182_s10 = sand.u32 1, %s2156_s25   ;;  %s184_s11 = sand.u32 1, %s2124_s17  }
  0x1f   : > { %s1347_s15 = sshll.u32 %s184_s11, 7  ;;  %s1446_s30 = sshll.u32 %s2148_s23, 11 }
  0x20   : > { %s2747_s1 = sld [smem:[#allocation20_spill]]  ;;  %s186_s29 = scalar_lea.vmem [#allocation6], %s1347_s15 }
  0x21   : > { %s193_s7 = sshll.u32 %s186_s29, 4  ;;  %p2319_p12 = pnand %p2727_p11, %p2288_p7  ;;  %s2313_s7 = int_to_ptr.vmem [resolvable:$true] %s193_s7 }
  0x22   : > { %s2324_s27 = scalar_lea.sflag [#allocation7], %s182_s10 }
  0x23   : > { %p1914_p3 = pneg %p2319_p12 }
  0x26   : > { %s2311_s4 = scalar_lea.hbm %s2747_s1, %s1446_s30  ;;  %s1917_s15 = scalar_lea.hbm %s2747_s1, 4096 }
  0x27   : > { %s1912_s28 = scalar_lea.hbm %s2311_s4, 2048  ;;  %p1918_p6 = scmp.lt.u32.totalorder %s2311_s4, %s2747_s1 }
  0x28   : > { %p1913_p0 = scmp.ne.s32.totalorder %s2311_s4, %s1912_s28  ;;  %p1919_p7 = scmp.lt.u32.totalorder %s1917_s15, %s1912_s28 }
  0x29   : > { %p1921_p11 = scmp.lt.u32.totalorder %s1912_s28, %s2311_s4 }
  0x2a   : > { %p1915_p4 = pnand %p1914_p3, %p1913_p0  ;;  %p1920_p10 = por %p1919_p7, %p1918_p6 }
  0x2c   : > { %p1916_p5 = pneg %p1915_p4  ;;  %p1922_p2 = por %p1921_p11, %p1920_p10 }
  0x2e   : > { %p1923_p1 = pnand %p1922_p2, %p1916_p5 }
  0x30   : > { %1926 = shalt.err (!%p1923_p1)
}
  0x31   : > { %s1927_s10 = scalar_lea.vmem %s2313_s7, 2048  ;;  %s2158_s11 = smov [#allocation6]  }
  0x32   : > { %p1928_p0 = scmp.ne.s32.totalorder %s2313_s7, %s1927_s10  ;;  %s1932_s6 = sshll.u32 %s2158_s11, 4  ;;  %s1933_s6 = int_to_ptr.vmem [resolvable:$false] %s1932_s6 }
  0x33   : > { %s1934_s30 = scalar_lea.vmem %s1933_s6, 4096  ;;  %p1935_p8 = scmp.lt.s32.totalorder %s2313_s7, %s1933_s6 }
  0x34   : > { %p1930_p4 = pnand %p1928_p0, %p1914_p3  ;;  %p1936_p6 = scmp.lt.s32.totalorder %s1934_s30, %s1927_s10 }
  0x36   : > { %p1931_p13 = pneg %p1930_p4  ;;  %p1937_p7 = por %p1936_p6, %p1935_p8 }
  0x38   : > { %p1938_p10 = pnand %p1937_p7, %p1931_p13 }
  0x3a   : > { %1941 = shalt.err (!%p1938_p10)
}
  0x3b   : > { %s2159_s28 = smov 64   ;;  %s2160_s15 = smov 4  }
  0x3c   : > { %1718 = dma.hbm_to_vmem [thread:$0]  (!%p2319_p12), %s2311_s4, 2048, %s2313_s7, %s2324_s27, %s2159_s28, %s2159_s28, %s2160_s15  }
  0x3d   : > { %p222_p1 = scmp.lt.s32.totalorder %s2156_s25, 5  ;;  %p2749_p2 = scmp.ge.s32.totalorder %s2156_s25, 1 }
  0x3e   : > { %s43_s10 = sadd.s32 1, %s2136_s20  ;;  %p50_p11 = scmp.ne.s32.totalorder %s2136_s20, %s2132_s19 }
  0x3f   : > { %p2355_p8 = pnand %p2749_p2, %p222_p1  ;;  %p2752_p13 = scmp.eq.s32.totalorder %s2156_s25, 0 }
  0x40   : > { %s2365_s11 = scalar_select %p2299_p9, %s2136_s20, %s43_s10  }
  0x41   : > { %p2369_p3 = por %p2752_p13, %p50_p11  ;;  %p56_p5 = scmp.ne.s32.totalorder %s2132_s19, %s2128_s18 }
  0x42   : > { %2751 = sst [smem:[#allocation19_spill]] %s2365_s11  ;;  %s158_s3 = sand.u32 1, %s2136_s20  }
  0x43   : > { %s1344_s4 = sshll.u32 %s2148_s23, 1  ;;  %p2754_p12 = scmp.eq.s32.totalorder %s2261_s26, 0 }
  0x44   : > { %s1342_s30 = sshll.u32 %s158_s3, 8  ;;  %s1445_s28 = sshll.u32 %s2152_s24, 7 }
  0x45   : > { %p2379_p0 = por %p2754_p12, %p56_p5  ;;  %s169_s15 = sadd.s32 %s1445_s28, %s1344_s4 }
  0x46   : > { %s1346_s9 = sshll.u32 %s169_s15, 6  ;;  %s162_s10 = scalar_lea.vmem [#allocation3], %s1342_s30 }
  0x47   : > { %s2755_s7 = scalar_select %p2379_p0, 1, 0 }
  0x48   : > { %s172_s1 = sshll.u32 %s162_s10, 4  ;;  %s2387_s22 = scalar_lea.hbm %s2720_s0, %s1346_s9  ;;  %s2389_s1 = int_to_ptr.vmem [resolvable:$true] %s172_s1 }
  0x49   : > { %p2756_p9 = scmp.lt.s32.totalorder %s2156_s25, 4  ;;  %s2399_s4 = scalar_lea.sflag [#allocation4], %s158_s3 }
  0x4a   : > { %s1942_s30 = scalar_lea.hbm %s2387_s22, 4096  ;;  %s1947_s6 = scalar_lea.hbm %s2720_s0, 16384 }
  0x4b   : > { %p2395_p4 = pnand %p2756_p9, %p2369_p3  ;;  %p1943_p6 = scmp.ne.s32.totalorder %s2387_s22, %s1942_s30 }
  0x4c   : > { %p1948_p2 = scmp.lt.u32.totalorder %s2387_s22, %s2720_s0  ;;  %p1949_p11 = scmp.lt.u32.totalorder %s1947_s6, %s1942_s30 }
  0x4d   : > { %p1944_p7 = pneg %p2395_p4  ;;  %p1951_p3 = scmp.lt.u32.totalorder %s1942_s30, %s2387_s22 }
  0x4e   : > { %p1950_p13 = por %p1949_p11, %p1948_p2 }
  0x4f   : > { %p1945_p10 = pnand %p1944_p7, %p1943_p6 }
  0x50   : > { %p1952_p5 = por %p1951_p3, %p1950_p13 }
  0x51   : > { %p1946_p1 = pneg %p1945_p10 }
  0x53   : > { %p1953_p12 = pnand %p1952_p5, %p1946_p1 }
  0x55   : > { %1956 = shalt.err (!%p1953_p12)
}
  0x56   : > { %s1957_s3 = scalar_lea.vmem %s2389_s1, 4096  ;;  %s2161_s9 = smov [#allocation3]  }
  0x57   : > { %p1958_p9 = scmp.ne.s32.totalorder %s2389_s1, %s1957_s3  ;;  %s1962_s10 = sshll.u32 %s2161_s9, 4  ;;  %s1963_s10 = int_to_ptr.vmem [resolvable:$false] %s1962_s10 }
  0x58   : > { %s1964_s17 = scalar_lea.vmem %s1963_s10, 8192  ;;  %p1965_p0 = scmp.lt.s32.totalorder %s2389_s1, %s1963_s10 }
  0x59   : > { %p1960_p6 = pnand %p1958_p9, %p1944_p7  ;;  %p1966_p2 = scmp.lt.s32.totalorder %s1964_s17, %s1957_s3 }
  0x5b   : > { %p1961_p10 = pneg %p1960_p6  ;;  %p1967_p11 = por %p1966_p2, %p1965_p0 }
  0x5d   : > { %p1968_p13 = pnand %p1967_p11, %p1961_p10 }
  0x5f   : > { %1971 = shalt.err (!%p1968_p13)
}
  0x60   : > { %s2162_s30 = smov 256   ;;  %s2733_s11 = smov 128  }
  0x61   : > { %s2734_s6 = smov 8   ;;  %s1339_s28 = sadd.s32 4294967294, %s2156_s25  }
  0x62   : > { %1715 = dma.hbm_to_vmem [thread:$0]  (!%p2395_p4), %s2387_s22, 4096, %s2389_s1, %s2399_s4, %s2162_s30, %s2733_s11, %s2734_s6  }
  0x63   : > { %s95_s15 = sadd.s32 1, %s2112_s14  ;;  %p102_p0 = scmp.ne.s32.totalorder %s2112_s14, %s2108_s13 }
  0x64   : > { %p2758_p7 = scmp.eq.s32.totalorder %s2284_s5, 0  ;;  %p2759_p1 = scmp.eq.s32.totalorder %s2156_s25, 0 }
  0x65   : > { %p108_p5 = scmp.ne.s32.totalorder %s2108_s13, %s2104_s12  ;;  %p132_p12 = scmp.eq.s32.totalorder %s2261_s26, 3 }
  0x66   : > { %s2436_s3 = scalar_select %p2758_p7, %s2112_s14, %s95_s15  }
  0x67   : > { %p2440_p3 = por %p102_p0, %p2759_p1  ;;  %p138_p9 = scmp.eq.s32.totalorder %s1339_s28, 3 }
  0x68   : > { %p2761_p6 = scmp.eq.s32.totalorder %s2261_s26, 0  ;;  %s205_s1 = sand.u32 1, %s2112_s14  }
  0x69   : > { %p2454_p4 = por %p132_p12, %p102_p0  ;;  %p2458_p2 = por %p138_p9, %p108_p5 }
  0x6a   : > { %p2449_p10 = por %p108_p5, %p2761_p6  ;;  %s1350_s4 = sshll.u32 %s205_s1, 8 }
  0x6b   : > { %s2763_s22 = scalar_select %p2454_p4, 1, 0 }
  0x6c   : > { %s2762_s18 = scalar_select %p2449_p10, 1, 0 }
  0x6d   : > { %s2764_s5 = scalar_select %p2458_p2, 1, 0 }
  0x6e   : > { %s1447_s10 = sshll.u32 %s2152_s24, 12  ;;  %s207_s15 = scalar_lea.vmem [#allocation8], %s1350_s4 }
  0x6f   : > { %s2466_s28 = scalar_lea.hbm %s2722_s2, %s1447_s10  ;;  %s214_s11 = sshll.u32 %s207_s15, 4  ;;  %s2476_s11 = int_to_ptr.vmem [resolvable:$true] %s214_s11 }
  0x70   : > { %p2765_p11 = scmp.lt.s32.totalorder %s2156_s25, 4  ;;  %s1972_s1 = scalar_lea.hbm %s2466_s28, 4096 }
  0x71   : > { %p1973_p0 = scmp.ne.s32.totalorder %s2466_s28, %s1972_s1  ;;  %s1977_s9 = scalar_lea.hbm %s2722_s2, 8192 }
  0x72   : > { %p2472_p13 = pnand %p2765_p11, %p2440_p3  ;;  %p1978_p3 = scmp.lt.u32.totalorder %s2466_s28, %s2722_s2 }
  0x73   : > { %p1979_p12 = scmp.lt.u32.totalorder %s1977_s9, %s1972_s1  ;;  %p1981_p6 = scmp.lt.u32.totalorder %s1972_s1, %s2466_s28 }
  0x74   : > { %p1974_p7 = pneg %p2472_p13 }
  0x75   : > { %p1980_p9 = por %p1979_p12, %p1978_p3 }
  0x76   : > { %p1975_p1 = pnand %p1974_p7, %p1973_p0 }
  0x77   : > { %p1982_p11 = por %p1981_p6, %p1980_p9 }
  0x78   : > { %p1976_p5 = pneg %p1975_p1 }
  0x7a   : > { %p1983_p2 = pnand %p1982_p11, %p1976_p5 }
  0x7c   : > { %1986 = shalt.err (!%p1983_p2)
}
  0x7d   : > { %s1987_s15 = scalar_lea.vmem %s2476_s11, 4096  ;;  %s2165_s4 = smov [#allocation8]  }
  0x7e   : > { %p1988_p0 = scmp.ne.s32.totalorder %s2476_s11, %s1987_s15  ;;  %s1992_s10 = sshll.u32 %s2165_s4, 4  ;;  %s1993_s10 = int_to_ptr.vmem [resolvable:$false] %s1992_s10 }
  0x7f   : > { %s1994_s17 = scalar_lea.vmem %s1993_s10, 8192  ;;  %p1995_p10 = scmp.lt.s32.totalorder %s2476_s11, %s1993_s10 }
  0x80   : > { %p1990_p1 = pnand %p1988_p0, %p1974_p7  ;;  %p1996_p3 = scmp.lt.s32.totalorder %s1994_s17, %s1987_s15 }
  0x82   : > { %p1991_p4 = pneg %p1990_p1  ;;  %p1997_p12 = por %p1996_p3, %p1995_p10 }
  0x84   : > { %p1998_p9 = pnand %p1997_p12, %p1991_p4 }
  0x86   : > { %2001 = shalt.err (!%p1998_p9)
}
  0x87   : > { %s2767_s1 = smov 8   ;;  %s2768_s9 = smov 128  }
  0x88   : > { %1721 = dma.hbm_to_vmem [thread:$0]  (!%p2472_p13), %s2466_s28, 4096, %s2476_s11, %s2324_s27, %s2768_s9, %s2768_s9, %s2767_s1  }
  0x89   : > { %226 = sbr.rel (%p2355_p8) target bundleno = 526 (0x20e), region = 32  ;;  %s228_s30 = sand.u32 (!%p2355_p8), 1, %s2132_s19  }
  0x8a   : > { %s1354_s4 = sshll.u32 (!%p2355_p8), %s228_s30, 8  ;;  %s229_s15 = scalar_lea.sflag (!%p2355_p8), [#allocation4], %s228_s30 }
  0x8b   : > { %s2510_s10 = scalar_lea.vmem (!%p2355_p8), [#allocation3], %s1354_s4  ;;  %p2769_p10 = scmp.ne.s32.totalorder (!%p2355_p8), %s2755_s7, 0 }
  0x90   : > { %2087 = dma.done.wait (%p2769_p10), %s229_s15, 4096  }
  0x91   : > { %2089 = vsyncadd (%p2769_p10), %s229_s15, 4294963200  ;;  %s237_s6 = sand.u32 1, %s2261_s26   ;;  %s239_s27 = sand.u32 1, %s2120_s16  }
  0x92   : > { %s1355_s11 = sshll.u32 %s239_s27, 7  ;;  %s238_s29 = scalar_lea.sflag [#allocation7], %s237_s6 }
  0x93   : > { %s2518_s28 = scalar_lea.vmem [#allocation6], %s1355_s11  ;;  %p2770_p8 = scmp.ne.s32.totalorder %s2745_s8, 0 }
  0x95   : > { %2091 = dma.done.wait (%p2770_p8), %s238_s29, 2048  }
  0x96   : > { %2093 = vsyncadd (%p2770_p8), %s238_s29, 4294965248  ;;  %s2525_s17 = sand.u32 1, %s2108_s13   ;;  %p2771_p4 = scmp.ne.s32.totalorder %s2762_s18, 0 }
  0x97   : > { %s1356_s7 = sshll.u32 %s2525_s17, 8 }
  0x98   : > { %s2528_s1 = scalar_lea.vmem [#allocation8], %s1356_s7 }
  0x99   : > { %2095 = dma.done.wait (%p2771_p4), %s238_s29, 4096  }
  0x9a   : > { %2097 = vsyncadd (%p2771_p4), %s238_s29, 4294963200  ;;  %s1357_s26 = sshll.u32 %s2525_s17, 7  ;;  %p1358_p2 = scmp.ne.s32.totalorder %s2140_s21, 0 }
  0x9b   : > { %s2535_s9 = scalar_lea.vmem [#allocation9], %s1357_s26  ;;  %v2166_v0 = vmov (!%p1358_p2), 0.0  }
  0x9c   : > { %292 = sbr.rel (%p1358_p2) target bundleno = 172 (0xac), region = 48  ;;  %293 = vst [vmem:[#allocation2] sm:$0xff] (!%p1358_p2), %v2166_v0  ;;  %294 = vst [vmem:[#allocation2 + $0x8] sm:$0xff] (!%p1358_p2), %v2166_v0 }
  0x9d   : > { %295 = vst [vmem:[#allocation2 + $0x10] sm:$0xff] (!%p1358_p2), %v2166_v0  ;;  %296 = vst [vmem:[#allocation2 + $0x18] sm:$0xff] (!%p1358_p2), %v2166_v0 }
  0x9e   : > { %297 = vst [vmem:[#allocation2 + $0x20] sm:$0xff] (!%p1358_p2), %v2166_v0  ;;  %298 = vst [vmem:[#allocation2 + $0x28] sm:$0xff] (!%p1358_p2), %v2166_v0 }
  0x9f   : > { %299 = vst [vmem:[#allocation2 + $0x30] sm:$0xff] (!%p1358_p2), %v2166_v0  ;;  %300 = vst [vmem:[#allocation2 + $0x38] sm:$0xff] (!%p1358_p2), %v2166_v0 }
  0xa0   : > { %301 = vst [vmem:[#allocation2 + $0x40] sm:$0xff] (!%p1358_p2), %v2166_v0  ;;  %302 = vst [vmem:[#allocation2 + $0x48] sm:$0xff] (!%p1358_p2), %v2166_v0 }
  0xa1   : > { %303 = vst [vmem:[#allocation2 + $0x50] sm:$0xff] (!%p1358_p2), %v2166_v0  ;;  %304 = vst [vmem:[#allocation2 + $0x58] sm:$0xff] (!%p1358_p2), %v2166_v0 }
  0xa2   : > { %305 = vst [vmem:[#allocation2 + $0x60] sm:$0xff] (!%p1358_p2), %v2166_v0  ;;  %306 = vst [vmem:[#allocation2 + $0x68] sm:$0xff] (!%p1358_p2), %v2166_v0 }
  0xa3   : > { %307 = vst [vmem:[#allocation2 + $0x70] sm:$0xff] %v2166_v0  ;;  %308 = vst [vmem:[#allocation2 + $0x78] sm:$0xff] %v2166_v0 }
  0xa4   : > { %309 = vst [vmem:[#allocation2 + $0x80] sm:$0xff] %v2166_v0  ;;  %310 = vst [vmem:[#allocation2 + $0x88] sm:$0xff] %v2166_v0 }
  0xa5   : > { %311 = vst [vmem:[#allocation2 + $0x90] sm:$0xff] %v2166_v0  ;;  %312 = vst [vmem:[#allocation2 + $0x98] sm:$0xff] %v2166_v0 }
  0xa6   : > { %313 = vst [vmem:[#allocation2 + $0xa0] sm:$0xff] %v2166_v0  ;;  %314 = vst [vmem:[#allocation2 + $0xa8] sm:$0xff] %v2166_v0 }
  0xa7   : > { %315 = vst [vmem:[#allocation2 + $0xb0] sm:$0xff] %v2166_v0  ;;  %316 = vst [vmem:[#allocation2 + $0xb8] sm:$0xff] %v2166_v0 }
  0xa8   : > { %317 = vst [vmem:[#allocation2 + $0xc0] sm:$0xff] %v2166_v0  ;;  %318 = vst [vmem:[#allocation2 + $0xc8] sm:$0xff] %v2166_v0 }
  0xa9   : > { %319 = vst [vmem:[#allocation2 + $0xd0] sm:$0xff] %v2166_v0  ;;  %320 = vst [vmem:[#allocation2 + $0xd8] sm:$0xff] %v2166_v0 }
  0xaa   : > { %321 = vst [vmem:[#allocation2 + $0xe0] sm:$0xff] %v2166_v0  ;;  %322 = vst [vmem:[#allocation2 + $0xe8] sm:$0xff] %v2166_v0 }
  0xab   : > { %323 = vst [vmem:[#allocation2 + $0xf0] sm:$0xff] %v2166_v0  ;;  %324 = vst [vmem:[#allocation2 + $0xf8] sm:$0xff] %v2166_v0 }
  0xac PF: > { %v1848_v1 = vld [vmem:[%s2518_s28 + $0x40] sm:$0xff]   ;;  %v1850_v3 = vld [vmem:[%s2518_s28 + $0x48] sm:$0xff]   ;;  %v1852_v5 = vld [vmem:[%s2518_s28 + $0x50] sm:$0xff]   ;;  %p1407_p13 = scmp.ne.s32.totalorder %s2140_s21, 1 }
  0xad   : > { %v1849_v2 = vld [vmem:[%s2518_s28] sm:$0xff]   ;;  %1576 = vmatprep.subr.bf16.mxu0 %v1848_v1  ;;  %1688 = vmatprep.subr.bf16.mxu1 %v1848_v1  ;;  %v1851_v4 = vld [vmem:[%s2518_s28 + $0x8] sm:$0xff]   ;;  %v1853_v6 = vld [vmem:[%s2518_s28 + $0x10] sm:$0xff]  }
  0xae   : > { %1577 = vmatpush3.bf16.msra.mxu0 %v1849_v2  ;;  %1696 = vmatpush3.bf16.msra.mxu1 %v1849_v2  ;;  %v1854_v7 = vld [vmem:[%s2518_s28 + $0x58] sm:$0xff]   ;;  %v1856_v9 = vld [vmem:[%s2518_s28 + $0x60] sm:$0xff]   ;;  %v1858_v11 = vld [vmem:[%s2518_s28 + $0x68] sm:$0xff]  }
  0xaf   : > { %1578 = vmatprep.subr.bf16.mxu0 %v1850_v3  ;;  %1689 = vmatprep.subr.bf16.mxu1 %v1850_v3  ;;  %v1855_v8 = vld [vmem:[%s2518_s28 + $0x18] sm:$0xff]   ;;  %v1857_v10 = vld [vmem:[%s2518_s28 + $0x20] sm:$0xff]   ;;  %v1859_v14 = vld [vmem:[%s2518_s28 + $0x28] sm:$0xff]  }
  0xb0   : > { %v1866_v12 = vld [vmem:[%s2510_s10 + $0x4] ss:$8 sps:$4 sm:$0xff]   ;;  %v1860_v15 = vld [vmem:[%s2518_s28 + $0x70] sm:$0xff]   ;;  %v1862_v17 = vld [vmem:[%s2518_s28 + $0x78] sm:$0xff]  }
  0xb1   : > { %v1869_v13 = vld [vmem:[%s2510_s10 + $0x84] ss:$8 sps:$4 sm:$0xff]   ;;  %709 = vmatprep.mubr.bf16.mxu0 %v1866_v12  ;;  %v1861_v16 = vld [vmem:[%s2518_s28 + $0x30] sm:$0xff]   ;;  %v1863_v18 = vld [vmem:[%s2518_s28 + $0x38] sm:$0xff]  }
  0xb2   : > { %1579 = vmatpush3.bf16.msra.mxu0 %v1851_v4  ;;  %1697 = vmatpush3.bf16.msra.mxu1 %v1851_v4  ;;  %v1864_v19 = vld [vmem:[%s2510_s10] ss:$8 sps:$4 sm:$0xff]   ;;  %v1870_v21 = vld [vmem:[%s2510_s10 + $0x14] ss:$8 sps:$4 sm:$0xff]   ;;  %v1874_v23 = vld [vmem:[%s2510_s10 + $0x10] ss:$8 sps:$4 sm:$0xff]  }
  0xb3   : > { %1580 = vmatprep.subr.bf16.mxu0 %v1852_v5  ;;  %1690 = vmatprep.subr.bf16.mxu1 %v1852_v5  ;;  %v1867_v20 = vld [vmem:[%s2510_s10 + $0x80] ss:$8 sps:$4 sm:$0xff]   ;;  %v1872_v22 = vld [vmem:[%s2510_s10 + $0x94] ss:$8 sps:$4 sm:$0xff]   ;;  %v1875_v24 = vld [vmem:[%s2510_s10 + $0x90] ss:$8 sps:$4 sm:$0xff]  }
  0xb4   : > { %773 = vmatprep.mubr.bf16.mxu1 %v1869_v13  ;;  %v1876_v25 = vld [vmem:[%s2510_s10 + $0x24] ss:$8 sps:$4 sm:$0xff]   ;;  %v1880_v27 = vld [vmem:[%s2510_s10 + $0x20] ss:$8 sps:$4 sm:$0xff]   ;;  %v1882_v29 = vld [vmem:[%s2510_s10 + $0x34] ss:$8 sps:$4 sm:$0xff]  }
  0xb5   : > { %v1878_v26 = vld [vmem:[%s2510_s10 + $0xa4] ss:$8 sps:$4 sm:$0xff]   ;;  %v1881_v28 = vld [vmem:[%s2510_s10 + $0xa0] ss:$8 sps:$4 sm:$0xff]   ;;  %v1884_v30 = vld [vmem:[%s2510_s10 + $0xb4] ss:$8 sps:$4 sm:$0xff]  }
  0xb6   : > { %1581 = vmatpush3.bf16.msra.mxu0 %v1853_v6  ;;  %1698 = vmatpush3.bf16.msra.mxu1 %v1853_v6  ;;  %v1886_v31 = vld [vmem:[%s2510_s10 + $0x30] ss:$8 sps:$4 sm:$0xff]   ;;  %v1888_v33 = vld [vmem:[%s2510_s10 + $0x44] ss:$8 sps:$4 sm:$0xff]   ;;  %v1892_v35 = vld [vmem:[%s2510_s10 + $0x40] ss:$8 sps:$4 sm:$0xff]  }
  0xb7   : > { %1582 = vmatprep.subr.bf16.mxu0 %v1854_v7  ;;  %1691 = vmatprep.subr.bf16.mxu1 %v1854_v7  ;;  %v1887_v32 = vld [vmem:[%s2510_s10 + $0xb0] ss:$8 sps:$4 sm:$0xff]   ;;  %v1890_v34 = vld [vmem:[%s2510_s10 + $0xc4] ss:$8 sps:$4 sm:$0xff]   ;;  %v1893_v36 = vld [vmem:[%s2510_s10 + $0xc0] ss:$8 sps:$4 sm:$0xff]  }
  0xb8   : > { %v1894_v37 = vld [vmem:[%s2510_s10 + $0x54] ss:$8 sps:$4 sm:$0xff]   ;;  %v1898_v39 = vld [vmem:[%s2510_s10 + $0x50] ss:$8 sps:$4 sm:$0xff]   ;;  %v1900_v41 = vld [vmem:[%s2510_s10 + $0x64] ss:$8 sps:$4 sm:$0xff]  }
  0xb9   : > { %v1896_v38 = vld [vmem:[%s2510_s10 + $0xd4] ss:$8 sps:$4 sm:$0xff]   ;;  %v1899_v40 = vld [vmem:[%s2510_s10 + $0xd0] ss:$8 sps:$4 sm:$0xff]   ;;  %v1902_v42 = vld [vmem:[%s2510_s10 + $0xe4] ss:$8 sps:$4 sm:$0xff]  }
  0xba   : > { %1583 = vmatpush3.bf16.msra.mxu0 %v1855_v8  ;;  %1699 = vmatpush3.bf16.msra.mxu1 %v1855_v8  ;;  %v1904_v43 = vld [vmem:[%s2510_s10 + $0x60] ss:$8 sps:$4 sm:$0xff]   ;;  %v1906_v45 = vld [vmem:[%s2510_s10 + $0x74] ss:$8 sps:$4 sm:$0xff]   ;;  %v1910_v47 = vld [vmem:[%s2510_s10 + $0x70] ss:$8 sps:$4 sm:$0xff]  }
  0xbb   : > { %1584 = vmatprep.subr.bf16.mxu0 %v1856_v9  ;;  %1692 = vmatprep.subr.bf16.mxu1 %v1856_v9  ;;  %v1905_v44 = vld [vmem:[%s2510_s10 + $0xe0] ss:$8 sps:$4 sm:$0xff]   ;;  %v1908_v46 = vld [vmem:[%s2510_s10 + $0xf4] ss:$8 sps:$4 sm:$0xff]   ;;  %v1911_v48 = vld [vmem:[%s2510_s10 + $0xf0] ss:$8 sps:$4 sm:$0xff]  }
  0xbc   : > { %v325_v51 = vld [vmem:[#allocation2] sm:$0xff]  ;;  %v326_v59 = vld [vmem:[#allocation2 + $0x8] sm:$0xff]  ;;  %v327_v7 = vld [vmem:[#allocation2 + $0x10] sm:$0xff] }
  0xbd   : > { %v341_v53 = vld [vmem:[#allocation2 + $0x80] sm:$0xff]  ;;  %v342_v61 = vld [vmem:[#allocation2 + $0x88] sm:$0xff]  ;;  %v343_v9 = vld [vmem:[#allocation2 + $0x90] sm:$0xff] }
  0xbe   : > { %1585 = vmatpush3.bf16.msra.mxu0 %v1857_v10  ;;  %1700 = vmatpush3.bf16.msra.mxu1 %v1857_v10 }
  0xbf   : > { %1586 = vmatprep.subr.bf16.mxu0 %v1858_v11  ;;  %1693 = vmatprep.subr.bf16.mxu1 %v1858_v11 }
  0xc2   : > { %1587 = vmatpush3.bf16.msra.mxu0 %v1859_v14  ;;  %1701 = vmatpush3.bf16.msra.mxu1 %v1859_v14 }
  0xc3   : > { %1588 = vmatprep.subr.bf16.mxu0 %v1860_v15  ;;  %1694 = vmatprep.subr.bf16.mxu1 %v1860_v15  ;;  %v328_v15 = vld [vmem:[#allocation2 + $0x18] sm:$0xff] }
  0xc6   : > { %1589 = vmatpush3.bf16.msra.mxu0 %v1861_v16  ;;  %1702 = vmatpush3.bf16.msra.mxu1 %v1861_v16 }
  0xc7   : > { %1590 = vmatprep.subr.bf16.mxu0 %v1862_v17  ;;  %1695 = vmatprep.subr.bf16.mxu1 %v1862_v17  ;;  %v344_v17 = vld [vmem:[#allocation2 + $0x98] sm:$0xff] }
  0xca   : > { %1591 = vmatpush3.bf16.msra.mxu0 %v1863_v18  ;;  %1703 = vmatpush3.bf16.msra.mxu1 %v1863_v18 }
  0xcd   : > { %710 = vmatmul.mubr.bf16.vlgmr.msra.gmra.mrb[0].mxu0 %v1864_v19  ;;  %774 = vmatmul.mubr.bf16.vlgmr.msra.gmra.mrb[0].mxu1 %v1867_v20 }
  0xce   : > { %717 = vmatprep.mubr.bf16.mxu0 %v1870_v21  ;;  %781 = vmatprep.mubr.bf16.mxu1 %v1872_v22 }
  0xd5   : > { %718 = vmatmul.mubr.bf16.gmra.mrb[4].mxu0 %v1874_v23  ;;  %782 = vmatmul.mubr.bf16.gmra.mrb[4].mxu1 %v1875_v24 }
  0xd6   : > { %725 = vmatprep.mubr.bf16.mxu0 %v1876_v25  ;;  %789 = vmatprep.mubr.bf16.mxu1 %v1878_v26 }
  0xdd   : > { %726 = vmatmul.mubr.bf16.gmra.mrb[8].mxu0 %v1880_v27  ;;  %790 = vmatmul.mubr.bf16.gmra.mrb[8].mxu1 %v1881_v28  ;;  %v329_v27 = vld [vmem:[#allocation2 + $0x20] sm:$0xff] }
  0xde   : > { %733 = vmatprep.mubr.bf16.mxu0 %v1882_v29  ;;  %797 = vmatprep.mubr.bf16.mxu1 %v1884_v30  ;;  %v345_v29 = vld [vmem:[#allocation2 + $0xa0] sm:$0xff] }
  0xe5   : > { %734 = vmatmul.mubr.bf16.gmra.mrb[12].mxu0 %v1886_v31  ;;  %798 = vmatmul.mubr.bf16.gmra.mrb[12].mxu1 %v1887_v32 }
  0xe6   : > { %741 = vmatprep.mubr.bf16.mxu0 %v1888_v33  ;;  %805 = vmatprep.mubr.bf16.mxu1 %v1890_v34 }
  0xed   : > { %742 = vmatmul.mubr.bf16.gmra.mrb[16].mxu0 %v1892_v35  ;;  %806 = vmatmul.mubr.bf16.gmra.mrb[16].mxu1 %v1893_v36  ;;  %v330_v35 = vld [vmem:[#allocation2 + $0x28] sm:$0xff] }
  0xee   : > { %749 = vmatprep.mubr.bf16.mxu0 %v1894_v37  ;;  %813 = vmatprep.mubr.bf16.mxu1 %v1896_v38  ;;  %v346_v37 = vld [vmem:[#allocation2 + $0xa8] sm:$0xff] }
  0xf5   : > { %750 = vmatmul.mubr.bf16.gmra.mrb[20].mxu0 %v1898_v39  ;;  %814 = vmatmul.mubr.bf16.gmra.mrb[20].mxu1 %v1899_v40 }
  0xf6   : > { %757 = vmatprep.mubr.bf16.mxu0 %v1900_v41  ;;  %821 = vmatprep.mubr.bf16.mxu1 %v1902_v42 }
  0xfd   : > { %758 = vmatmul.mubr.bf16.gmra.mrb[24].mxu0 %v1904_v43  ;;  %822 = vmatmul.mubr.bf16.gmra.mrb[24].mxu1 %v1905_v44 }
  0xfe   : > { %765 = vmatprep.mubr.bf16.mxu0 %v1906_v45  ;;  %829 = vmatprep.mubr.bf16.mxu1 %v1908_v46 }
 0x105   : > { %766 = vmatmul.mubr.bf16.gmra.mrb[28].mxu0 %v1910_v47  ;;  %830 = vmatmul.mubr.bf16.gmra.mrb[28].mxu1 %v1911_v48  ;;  %v331_v47 = vld [vmem:[#allocation2 + $0x30] sm:$0xff] }
 0x1a0   : > { %v1592_v49 = vpop.f32.mrb[0].mxu0  ;;  %v1640_v50 = vpop.f32.mrb[0].mxu1 }
 0x1a1   : > { %v1593_v52 = vpop.f32.mrb[1].mxu0  ;;  %v1641_v54 = vpop.f32.mrb[1].mxu1 }
 0x1a2   : > { %v1594_v55 = vadd.f32 %v1593_v52, %v1592_v49  ;;  %v1642_v56 = vadd.f32 %v1641_v54, %v1640_v50  ;;  %v1595_v57 = vpop.f32.mrb[2].mxu0  ;;  %v1643_v58 = vpop.f32.mrb[2].mxu1  ;;  %v347_v49 = vld [vmem:[#allocation2 + $0xb0] sm:$0xff] }
 0x1a3   : > { %v1596_v60 = vpop.f32.mrb[3].mxu0  ;;  %v1644_v62 = vpop.f32.mrb[3].mxu1 }
 0x1a4   : > { %v838_v63 = vadd.f32 %v1594_v55, %v325_v51  ;;  %v854_v0 = vadd.f32 %v1642_v56, %v341_v53  ;;  %v1597_v1 = vadd.f32 %v1596_v60, %v1595_v57  ;;  %v1645_v2 = vadd.f32 %v1644_v62, %v1643_v58  ;;  %v332_v55 = vld [vmem:[#allocation2 + $0x38] sm:$0xff] }
 0x1a5   : > { %v348_v57 = vld [vmem:[#allocation2 + $0xb8] sm:$0xff] }
 0x1a6   : > { %870 = vst [vmem:[#allocation2] sm:$0xff] %v838_v63  ;;  %886 = vst [vmem:[#allocation2 + $0x80] sm:$0xff] %v854_v0  ;;  %v839_v3 = vadd.f32 %v1597_v1, %v326_v59  ;;  %v855_v4 = vadd.f32 %v1645_v2, %v342_v61 }
 0x1a8   : > { %871 = vst [vmem:[#allocation2 + $0x8] sm:$0xff] %v839_v3  ;;  %887 = vst [vmem:[#allocation2 + $0x88] sm:$0xff] %v855_v4  ;;  %v1598_v5 = vpop.f32.mrb[4].mxu0  ;;  %v1646_v6 = vpop.f32.mrb[4].mxu1  ;;  %v333_v3 = vld [vmem:[#allocation2 + $0x40] sm:$0xff] }
 0x1a9   : > { %v1599_v8 = vpop.f32.mrb[5].mxu0  ;;  %v1647_v10 = vpop.f32.mrb[5].mxu1 }
 0x1aa   : > { %v1600_v11 = vadd.f32 %v1599_v8, %v1598_v5  ;;  %v1648_v12 = vadd.f32 %v1647_v10, %v1646_v6  ;;  %v1601_v13 = vpop.f32.mrb[6].mxu0  ;;  %v1649_v14 = vpop.f32.mrb[6].mxu1  ;;  %v349_v5 = vld [vmem:[#allocation2 + $0xc0] sm:$0xff] }
 0x1ab   : > { %v1602_v16 = vpop.f32.mrb[7].mxu0  ;;  %v1650_v18 = vpop.f32.mrb[7].mxu1 }
 0x1ac   : > { %v840_v19 = vadd.f32 %v1600_v11, %v327_v7  ;;  %v856_v20 = vadd.f32 %v1648_v12, %v343_v9  ;;  %v1603_v21 = vadd.f32 %v1602_v16, %v1601_v13  ;;  %v1651_v22 = vadd.f32 %v1650_v18, %v1649_v14  ;;  %v334_v11 = vld [vmem:[#allocation2 + $0x48] sm:$0xff] }
 0x1ad   : > { %v350_v13 = vld [vmem:[#allocation2 + $0xc8] sm:$0xff] }
 0x1ae   : > { %872 = vst [vmem:[#allocation2 + $0x10] sm:$0xff] %v840_v19  ;;  %888 = vst [vmem:[#allocation2 + $0x90] sm:$0xff] %v856_v20  ;;  %v841_v23 = vadd.f32 %v1603_v21, %v328_v15  ;;  %v857_v24 = vadd.f32 %v1651_v22, %v344_v17 }
 0x1b0   : > { %873 = vst [vmem:[#allocation2 + $0x18] sm:$0xff] %v841_v23  ;;  %889 = vst [vmem:[#allocation2 + $0x98] sm:$0xff] %v857_v24  ;;  %v1604_v25 = vpop.f32.mrb[8].mxu0  ;;  %v1652_v26 = vpop.f32.mrb[8].mxu1  ;;  %v335_v23 = vld [vmem:[#allocation2 + $0x50] sm:$0xff] }
 0x1b1   : > { %v1605_v28 = vpop.f32.mrb[9].mxu0  ;;  %v1653_v30 = vpop.f32.mrb[9].mxu1 }
 0x1b2   : > { %v1606_v31 = vadd.f32 %v1605_v28, %v1604_v25  ;;  %v1654_v32 = vadd.f32 %v1653_v30, %v1652_v26  ;;  %v1607_v33 = vpop.f32.mrb[10].mxu0  ;;  %v1655_v34 = vpop.f32.mrb[10].mxu1  ;;  %v351_v25 = vld [vmem:[#allocation2 + $0xd0] sm:$0xff] }
 0x1b3   : > { %v1608_v36 = vpop.f32.mrb[11].mxu0  ;;  %v1656_v38 = vpop.f32.mrb[11].mxu1 }
 0x1b4   : > { %v842_v39 = vadd.f32 %v1606_v31, %v329_v27  ;;  %v858_v40 = vadd.f32 %v1654_v32, %v345_v29  ;;  %v1609_v41 = vadd.f32 %v1608_v36, %v1607_v33  ;;  %v1657_v42 = vadd.f32 %v1656_v38, %v1655_v34  ;;  %v336_v31 = vld [vmem:[#allocation2 + $0x58] sm:$0xff] }
 0x1b5   : > { %v352_v33 = vld [vmem:[#allocation2 + $0xd8] sm:$0xff] }
 0x1b6   : > { %874 = vst [vmem:[#allocation2 + $0x20] sm:$0xff] %v842_v39  ;;  %890 = vst [vmem:[#allocation2 + $0xa0] sm:$0xff] %v858_v40  ;;  %v843_v43 = vadd.f32 %v1609_v41, %v330_v35  ;;  %v859_v44 = vadd.f32 %v1657_v42, %v346_v37 }
 0x1b8   : > { %875 = vst [vmem:[#allocation2 + $0x28] sm:$0xff] %v843_v43  ;;  %891 = vst [vmem:[#allocation2 + $0xa8] sm:$0xff] %v859_v44  ;;  %v1610_v45 = vpop.f32.mrb[12].mxu0  ;;  %v1658_v46 = vpop.f32.mrb[12].mxu1  ;;  %v337_v43 = vld [vmem:[#allocation2 + $0x60] sm:$0xff] }
 0x1b9   : > { %v1611_v48 = vpop.f32.mrb[13].mxu0  ;;  %v1659_v50 = vpop.f32.mrb[13].mxu1 }
 0x1ba   : > { %v1612_v51 = vadd.f32 %v1611_v48, %v1610_v45  ;;  %v1660_v52 = vadd.f32 %v1659_v50, %v1658_v46  ;;  %v1613_v53 = vpop.f32.mrb[14].mxu0  ;;  %v1661_v54 = vpop.f32.mrb[14].mxu1  ;;  %v353_v45 = vld [vmem:[#allocation2 + $0xe0] sm:$0xff] }
 0x1bb   : > { %v1614_v56 = vpop.f32.mrb[15].mxu0  ;;  %v1662_v58 = vpop.f32.mrb[15].mxu1 }
 0x1bc   : > { %v844_v59 = vadd.f32 %v1612_v51, %v331_v47  ;;  %v860_v60 = vadd.f32 %v1660_v52, %v347_v49  ;;  %v1615_v61 = vadd.f32 %v1614_v56, %v1613_v53  ;;  %v1663_v62 = vadd.f32 %v1662_v58, %v1661_v54  ;;  %v338_v51 = vld [vmem:[#allocation2 + $0x68] sm:$0xff] }
 0x1bd   : > { %v354_v53 = vld [vmem:[#allocation2 + $0xe8] sm:$0xff] }
 0x1be   : > { %876 = vst [vmem:[#allocation2 + $0x30] sm:$0xff] %v844_v59  ;;  %892 = vst [vmem:[#allocation2 + $0xb0] sm:$0xff] %v860_v60  ;;  %v845_v63 = vadd.f32 %v1615_v61, %v332_v55  ;;  %v861_v0 = vadd.f32 %v1663_v62, %v348_v57 }
 0x1c0   : > { %877 = vst [vmem:[#allocation2 + $0x38] sm:$0xff] %v845_v63  ;;  %893 = vst [vmem:[#allocation2 + $0xb8] sm:$0xff] %v861_v0  ;;  %v1616_v1 = vpop.f32.mrb[16].mxu0  ;;  %v1664_v2 = vpop.f32.mrb[16].mxu1  ;;  %v339_v63 = vld [vmem:[#allocation2 + $0x70] sm:$0xff] }
 0x1c1   : > { %v1617_v4 = vpop.f32.mrb[17].mxu0  ;;  %v1665_v6 = vpop.f32.mrb[17].mxu1 }
 0x1c2   : > { %v1618_v7 = vadd.f32 %v1617_v4, %v1616_v1  ;;  %v1666_v8 = vadd.f32 %v1665_v6, %v1664_v2  ;;  %v1619_v9 = vpop.f32.mrb[18].mxu0  ;;  %v1667_v10 = vpop.f32.mrb[18].mxu1  ;;  %v355_v1 = vld [vmem:[#allocation2 + $0xf0] sm:$0xff] }
 0x1c3   : > { %v1620_v12 = vpop.f32.mrb[19].mxu0  ;;  %v1668_v14 = vpop.f32.mrb[19].mxu1 }
 0x1c4   : > { %v846_v15 = vadd.f32 %v1618_v7, %v333_v3  ;;  %v862_v16 = vadd.f32 %v1666_v8, %v349_v5  ;;  %v1621_v17 = vadd.f32 %v1620_v12, %v1619_v9  ;;  %v1669_v18 = vadd.f32 %v1668_v14, %v1667_v10  ;;  %v340_v7 = vld [vmem:[#allocation2 + $0x78] sm:$0xff] }
 0x1c5   : > { %v356_v9 = vld [vmem:[#allocation2 + $0xf8] sm:$0xff] }
 0x1c6   : > { %878 = vst [vmem:[#allocation2 + $0x40] sm:$0xff] %v846_v15  ;;  %894 = vst [vmem:[#allocation2 + $0xc0] sm:$0xff] %v862_v16  ;;  %v847_v19 = vadd.f32 %v1621_v17, %v334_v11  ;;  %v863_v20 = vadd.f32 %v1669_v18, %v350_v13  ;;  %v906_v17 = vld [vmem:[#allocation2] sm:$0xff] (!%p1407_p13)  ;;  %v907_v18 = vld [vmem:[#allocation2 + $0x8] sm:$0xff] (!%p1407_p13) }
 0x1c8   : > { %879 = vst [vmem:[#allocation2 + $0x48] sm:$0xff] %v847_v19  ;;  %895 = vst [vmem:[#allocation2 + $0xc8] sm:$0xff] %v863_v20  ;;  %v1622_v21 = vpop.f32.mrb[20].mxu0  ;;  %v1670_v22 = vpop.f32.mrb[20].mxu1  ;;  %v938_v19 = vld [vmem:[%s2528_s1] sm:$0xff] (!%p1407_p13)  ;;  %v939_v20 = vld [vmem:[%s2528_s1 + $0x8] sm:$0xff] (!%p1407_p13) }
 0x1c9   : > { %v1623_v24 = vpop.f32.mrb[21].mxu0  ;;  %v1671_v26 = vpop.f32.mrb[21].mxu1 }
 0x1ca   : > { %v1624_v27 = vadd.f32 %v1623_v24, %v1622_v21  ;;  %v1672_v28 = vadd.f32 %v1671_v26, %v1670_v22  ;;  %v1625_v29 = vpop.f32.mrb[22].mxu0  ;;  %v1673_v30 = vpop.f32.mrb[22].mxu1  ;;  %v970_v21 = vadd.f32 (!%p1407_p13), %v938_v19, %v906_v17  ;;  %v908_v22 = vld [vmem:[#allocation2 + $0x10] sm:$0xff] (!%p1407_p13)  ;;  %v971_v24 = vadd.f32 (!%p1407_p13), %v939_v20, %v907_v18  ;;  %v941_v26 = vld [vmem:[%s2528_s1 + $0x18] sm:$0xff] (!%p1407_p13)  ;;  %v923_v20 = vld [vmem:[#allocation2 + $0x88] sm:$0xff] (!%p1407_p13) }
 0x1cb   : > { %v1626_v32 = vpop.f32.mrb[23].mxu0  ;;  %v1674_v34 = vpop.f32.mrb[23].mxu1 }
 0x1cc   : > { %v848_v35 = vadd.f32 %v1624_v27, %v335_v23  ;;  %v864_v36 = vadd.f32 %v1672_v28, %v351_v25  ;;  %v1627_v37 = vadd.f32 %v1626_v32, %v1625_v29  ;;  %v1675_v38 = vadd.f32 %v1674_v34, %v1673_v30  ;;  %v909_v23 = vld [vmem:[#allocation2 + $0x18] sm:$0xff] (!%p1407_p13)  ;;  %v940_v25 = vld [vmem:[%s2528_s1 + $0x10] sm:$0xff] (!%p1407_p13)  ;;  %v910_v27 = vld [vmem:[#allocation2 + $0x20] sm:$0xff] (!%p1407_p13) }
 0x1cd   : > { %v1002_v28 = vmax.f32 (!%p1407_p13), %v970_v21, 0.0  ;;  %v972_v29 = vadd.f32 (!%p1407_p13), %v940_v25, %v908_v22  ;;  %v973_v30 = vadd.f32 (!%p1407_p13), %v941_v26, %v909_v23  ;;  %v942_v32 = vld [vmem:[%s2528_s1 + $0x20] sm:$0xff] (!%p1407_p13)  ;;  %v1003_v34 = vmax.f32 (!%p1407_p13), %v971_v24, 0.0  ;;  %v955_v22 = vld [vmem:[%s2528_s1 + $0x88] sm:$0xff] (!%p1407_p13) }
 0x1ce   : > { %880 = vst [vmem:[#allocation2 + $0x50] sm:$0xff] %v848_v35  ;;  %896 = vst [vmem:[#allocation2 + $0xd0] sm:$0xff] %v864_v36  ;;  %v849_v39 = vadd.f32 %v1627_v37, %v336_v31  ;;  %v865_v40 = vadd.f32 %v1675_v38, %v352_v33  ;;  %v911_v31 = vld [vmem:[#allocation2 + $0x28] sm:$0xff] (!%p1407_p13)  ;;  %v974_v35 = vadd.f32 (!%p1407_p13), %v942_v32, %v910_v27  ;;  %v912_v37 = vld [vmem:[#allocation2 + $0x30] sm:$0xff] (!%p1407_p13) }
 0x1cf   : > { %v943_v33 = vld [vmem:[%s2528_s1 + $0x28] sm:$0xff] (!%p1407_p13)  ;;  %v913_v38 = vld [vmem:[#allocation2 + $0x38] sm:$0xff] (!%p1407_p13)  ;;  %v954_v21 = vld [vmem:[%s2528_s1 + $0x80] sm:$0xff] (!%p1407_p13)  ;;  %v987_v26 = vadd.f32 (!%p1407_p13), %v955_v22, %v923_v20 }
 0x1d0   : > { %881 = vst [vmem:[#allocation2 + $0x58] sm:$0xff] %v849_v39  ;;  %897 = vst [vmem:[#allocation2 + $0xd8] sm:$0xff] %v865_v40  ;;  %v1628_v41 = vpop.f32.mrb[24].mxu0  ;;  %v1676_v42 = vpop.f32.mrb[24].mxu1  ;;  %v975_v36 = vadd.f32 (!%p1407_p13), %v943_v33, %v911_v31  ;;  %v944_v39 = vld [vmem:[%s2528_s1 + $0x30] sm:$0xff] (!%p1407_p13)  ;;  %v1004_v40 = vmax.f32 (!%p1407_p13), %v972_v29, 0.0 }
 0x1d1   : > { %v1629_v44 = vpop.f32.mrb[25].mxu0  ;;  %v1677_v46 = vpop.f32.mrb[25].mxu1  ;;  %v924_v27 = vld [vmem:[#allocation2 + $0x90] sm:$0xff] (!%p1407_p13)  ;;  %v957_v32 = vld [vmem:[%s2528_s1 + $0x98] sm:$0xff] (!%p1407_p13) }
 0x1d2   : > { %v1630_v47 = vadd.f32 %v1629_v44, %v1628_v41  ;;  %v1678_v48 = vadd.f32 %v1677_v46, %v1676_v42  ;;  %v1631_v49 = vpop.f32.mrb[26].mxu0  ;;  %v1679_v50 = vpop.f32.mrb[26].mxu1  ;;  %v1005_v41 = vmax.f32 (!%p1407_p13), %v973_v30, 0.0  ;;  %v945_v42 = vld [vmem:[%s2528_s1 + $0x38] sm:$0xff] (!%p1407_p13)  ;;  %v914_v44 = vld [vmem:[#allocation2 + $0x40] sm:$0xff] (!%p1407_p13)  ;;  %v1484_v46 = vpack.c.bf16 (!%p1407_p13), %v1003_v34, %v1002_v28  ;;  %v956_v29 = vld [vmem:[%s2528_s1 + $0x90] sm:$0xff] (!%p1407_p13) }
 0x1d3   : > { %v1632_v52 = vpop.f32.mrb[27].mxu0  ;;  %v1680_v54 = vpop.f32.mrb[27].mxu1  ;;  %v925_v28 = vld [vmem:[#allocation2 + $0x98] sm:$0xff] (!%p1407_p13)  ;;  %v988_v33 = vadd.f32 (!%p1407_p13), %v956_v29, %v924_v27  ;;  %v926_v34 = vld [vmem:[#allocation2 + $0xa0] sm:$0xff] (!%p1407_p13) }
 0x1d4   : > { %v850_v55 = vadd.f32 %v1630_v47, %v337_v43  ;;  %v866_v56 = vadd.f32 %v1678_v48, %v353_v45  ;;  %v1633_v57 = vadd.f32 %v1632_v52, %v1631_v49  ;;  %v1681_v58 = vadd.f32 %v1680_v54, %v1679_v50  ;;  %v915_v45 = vld [vmem:[#allocation2 + $0x48] sm:$0xff] (!%p1407_p13)  ;;  %v946_v50 = vld [vmem:[%s2528_s1 + $0x40] sm:$0xff] (!%p1407_p13)  ;;  %1485 = vst [vmem:[%s2535_s9] sm:$0xff] (!%p1407_p13), %v1484_v46   ;;  %v969_v22 = vld [vmem:[%s2528_s1 + $0xf8] sm:$0xff] (!%p1407_p13) }
 0x1d5   : > { %v976_v43 = vadd.f32 (!%p1407_p13), %v944_v39, %v912_v37  ;;  %v1006_v47 = vmax.f32 (!%p1407_p13), %v974_v35, 0.0  ;;  %v1007_v48 = vmax.f32 (!%p1407_p13), %v975_v36, 0.0  ;;  %v977_v49 = vadd.f32 (!%p1407_p13), %v945_v42, %v913_v38  ;;  %v916_v52 = vld [vmem:[#allocation2 + $0x50] sm:$0xff] (!%p1407_p13)  ;;  %v927_v35 = vld [vmem:[#allocation2 + $0xa8] sm:$0xff] (!%p1407_p13) }
 0x1d6   : > { %882 = vst [vmem:[#allocation2 + $0x60] sm:$0xff] %v850_v55  ;;  %898 = vst [vmem:[#allocation2 + $0xe0] sm:$0xff] %v866_v56  ;;  %v851_v59 = vadd.f32 %v1633_v57, %v338_v51  ;;  %v867_v60 = vadd.f32 %v1681_v58, %v354_v53  ;;  %v947_v51 = vld [vmem:[%s2528_s1 + $0x48] sm:$0xff] (!%p1407_p13)  ;;  %v1489_v53 = vpack.c.bf16 (!%p1407_p13), %v1005_v41, %v1004_v40  ;;  %v948_v58 = vld [vmem:[%s2528_s1 + $0x50] sm:$0xff] (!%p1407_p13)  ;;  %v1019_v38 = vmax.f32 (!%p1407_p13), %v987_v26, 0.0 }
 0x1d7   : > { %v1008_v54 = vmax.f32 (!%p1407_p13), %v976_v43, 0.0  ;;  %v978_v55 = vadd.f32 (!%p1407_p13), %v946_v50, %v914_v44  ;;  %v979_v56 = vadd.f32 (!%p1407_p13), %v947_v51, %v915_v45  ;;  %v917_v57 = vld [vmem:[#allocation2 + $0x58] sm:$0xff] (!%p1407_p13)  ;;  %v989_v39 = vadd.f32 (!%p1407_p13), %v957_v32, %v925_v28  ;;  %v958_v40 = vld [vmem:[%s2528_s1 + $0xa0] sm:$0xff] (!%p1407_p13)  ;;  %v959_v41 = vld [vmem:[%s2528_s1 + $0xa8] sm:$0xff] (!%p1407_p13) }
 0x1d8   : > { %883 = vst [vmem:[#allocation2 + $0x68] sm:$0xff] %v851_v59  ;;  %899 = vst [vmem:[#allocation2 + $0xe8] sm:$0xff] %v867_v60  ;;  %v1634_v61 = vpop.f32.mrb[28].mxu0  ;;  %v1682_v62 = vpop.f32.mrb[28].mxu1  ;;  %v949_v59 = vld [vmem:[%s2528_s1 + $0x58] sm:$0xff] (!%p1407_p13)  ;;  %v1494_v60 = vpack.c.bf16 (!%p1407_p13), %v1007_v48, %v1006_v47  ;;  %v928_v42 = vld [vmem:[#allocation2 + $0xb0] sm:$0xff] (!%p1407_p13)  ;;  %v990_v45 = vadd.f32 (!%p1407_p13), %v958_v40, %v926_v34  ;;  %v991_v46 = vadd.f32 (!%p1407_p13), %v959_v41, %v927_v35 }
 0x1d9   : > { %v1635_v0 = vpop.f32.mrb[29].mxu0  ;;  %v1683_v2 = vpop.f32.mrb[29].mxu1  ;;  %1561 = vst [vmem:[%s2535_s9 + $0x8] sm:$0xff] (!%p1407_p13), %v1489_v53   ;;  %v1020_v44 = vmax.f32 (!%p1407_p13), %v988_v33, 0.0  ;;  %v929_v47 = vld [vmem:[#allocation2 + $0xb8] sm:$0xff] (!%p1407_p13)  ;;  %v960_v48 = vld [vmem:[%s2528_s1 + $0xb0] sm:$0xff] (!%p1407_p13) }
 0x1da   : > { %v1636_v3 = vadd.f32 %v1635_v0, %v1634_v61  ;;  %v1684_v4 = vadd.f32 %v1683_v2, %v1682_v62  ;;  %v1637_v5 = vpop.f32.mrb[30].mxu0  ;;  %v1685_v6 = vpop.f32.mrb[30].mxu1  ;;  %905 = sbr.rel (%p1407_p13) target bundleno = 498 (0x1f2), region = 52  ;;  %v1009_v61 = vmax.f32 (!%p1407_p13), %v977_v49, 0.0  ;;  %v980_v62 = vadd.f32 (!%p1407_p13), %v948_v58, %v916_v52  ;;  %v950_v2 = vld [vmem:[%s2528_s1 + $0x60] sm:$0xff] (!%p1407_p13)  ;;  %1562 = vst [vmem:[%s2535_s9 + $0x10] sm:$0xff] (!%p1407_p13), %v1494_v60  }
 0x1db   : > { %v1638_v8 = vpop.f32.mrb[31].mxu0  ;;  %v1686_v10 = vpop.f32.mrb[31].mxu1  ;;  %v961_v49 = vld [vmem:[%s2528_s1 + $0xb8] sm:$0xff] (!%p1407_p13)  ;;  %v1021_v51 = vmax.f32 (!%p1407_p13), %v989_v39, 0.0  ;;  %v992_v52 = vadd.f32 (!%p1407_p13), %v960_v48, %v928_v42  ;;  %v1023_v58 = vmax.f32 (!%p1407_p13), %v991_v46, 0.0 }
 0x1dc   : > { %v852_v11 = vadd.f32 %v1636_v3, %v339_v63  ;;  %v868_v12 = vadd.f32 %v1684_v4, %v355_v1  ;;  %v1639_v13 = vadd.f32 %v1638_v8, %v1637_v5  ;;  %v1687_v14 = vadd.f32 %v1686_v10, %v1685_v6  ;;  %v951_v5 = vld [vmem:[%s2528_s1 + $0x68] sm:$0xff] (!%p1407_p13) }
 0x1dd   : > { %v981_v63 = vadd.f32 (!%p1407_p13), %v949_v59, %v917_v57  ;;  %v918_v0 = vld [vmem:[#allocation2 + $0x60] sm:$0xff] (!%p1407_p13)  ;;  %v1010_v3 = vmax.f32 (!%p1407_p13), %v978_v55, 0.0  ;;  %v1011_v4 = vmax.f32 (!%p1407_p13), %v979_v56, 0.0  ;;  %v1012_v10 = vmax.f32 (!%p1407_p13), %v980_v62, 0.0  ;;  %v931_v55 = vld [vmem:[#allocation2 + $0xc8] sm:$0xff] (!%p1407_p13)  ;;  %v933_v62 = vld [vmem:[#allocation2 + $0xd8] sm:$0xff] (!%p1407_p13) }
 0x1de   : > { %884 = vst [vmem:[#allocation2 + $0x70] sm:$0xff] %v852_v11  ;;  %900 = vst [vmem:[#allocation2 + $0xf0] sm:$0xff] %v868_v12  ;;  %v853_v15 = vadd.f32 %v1639_v13, %v340_v7  ;;  %v869_v16 = vadd.f32 %v1687_v14, %v356_v9  ;;  %v982_v6 = vadd.f32 (!%p1407_p13), %v950_v2, %v918_v0  ;;  %v952_v13 = vld [vmem:[%s2528_s1 + $0x70] sm:$0xff] (!%p1407_p13)  ;;  %v953_v14 = vld [vmem:[%s2528_s1 + $0x78] sm:$0xff] (!%p1407_p13)  ;;  %v1022_v57 = vmax.f32 (!%p1407_p13), %v990_v45, 0.0 }
 0x1df   : > { %v919_v1 = vld [vmem:[#allocation2 + $0x68] sm:$0xff] (!%p1407_p13)  ;;  %v1499_v9 = vpack.c.bf16 (!%p1407_p13), %v1009_v61, %v1008_v54  ;;  %v1013_v11 = vmax.f32 (!%p1407_p13), %v981_v63, 0.0  ;;  %v993_v53 = vadd.f32 (!%p1407_p13), %v961_v49, %v929_v47  ;;  %v930_v54 = vld [vmem:[#allocation2 + $0xc0] sm:$0xff] (!%p1407_p13)  ;;  %v932_v61 = vld [vmem:[#allocation2 + $0xd0] sm:$0xff] (!%p1407_p13)  ;;  %v1529_v63 = vpack.c.bf16 (!%p1407_p13), %v1021_v51, %v1020_v44 }
 0x1e0   : > { %885 = vst [vmem:[#allocation2 + $0x78] sm:$0xff] %v853_v15  ;;  %901 = vst [vmem:[#allocation2 + $0xf8] sm:$0xff] %v869_v16  ;;  %v983_v12 = vadd.f32 (!%p1407_p13), %v951_v5, %v919_v1  ;;  %v922_v15 = vld [vmem:[#allocation2 + $0x80] sm:$0xff] (!%p1407_p13)  ;;  %v1504_v16 = vpack.c.bf16 (!%p1407_p13), %v1011_v4, %v1010_v3  ;;  %v1014_v17 = vmax.f32 (!%p1407_p13), %v982_v6, 0.0  ;;  %v963_v59 = vld [vmem:[%s2528_s1 + $0xc8] sm:$0xff] (!%p1407_p13)  ;;  %v1024_v0 = vmax.f32 (!%p1407_p13), %v992_v52, 0.0 }
 0x1e1   : > { %1563 = vst [vmem:[%s2535_s9 + $0x18] sm:$0xff] %v1499_v9   ;;  %v1509_v23 = vpack.c.bf16 %v1013_v11, %v1012_v10  ;;  %v986_v25 = vadd.f32 %v954_v21, %v922_v15  ;;  %v962_v56 = vld [vmem:[%s2528_s1 + $0xc0] sm:$0xff]  ;;  %v1025_v1 = vmax.f32 %v993_v53, 0.0  ;;  %v995_v2 = vadd.f32 %v963_v59, %v931_v55  ;;  %v964_v3 = vld [vmem:[%s2528_s1 + $0xd0] sm:$0xff]  ;;  %v965_v4 = vld [vmem:[%s2528_s1 + $0xd8] sm:$0xff] }
 0x1e2   : > { %v1015_v24 = vmax.f32 %v983_v12, 0.0  ;;  %1564 = vst [vmem:[%s2535_s9 + $0x20] sm:$0xff] %v1504_v16   ;;  %v994_v60 = vadd.f32 %v962_v56, %v930_v54  ;;  %v934_v5 = vld [vmem:[#allocation2 + $0xe0] sm:$0xff]  ;;  %v1534_v6 = vpack.c.bf16 %v1023_v58, %v1022_v57  ;;  %v997_v9 = vadd.f32 %v965_v4, %v933_v62  ;;  %v935_v10 = vld [vmem:[#allocation2 + $0xe8] sm:$0xff]  ;;  %1569 = vst [vmem:[%s2535_s9 + $0x48] sm:$0xff] %v1529_v63  }
 0x1e3   : > { %1565 = vst [vmem:[%s2535_s9 + $0x28] sm:$0xff] %v1509_v23   ;;  %v1018_v37 = vmax.f32 %v986_v25, 0.0  ;;  %v966_v11 = vld [vmem:[%s2528_s1 + $0xe0] sm:$0xff]  ;;  %v967_v12 = vld [vmem:[%s2528_s1 + $0xe8] sm:$0xff] }
 0x1e4   : > { %v1514_v36 = vpack.c.bf16 %v1015_v24, %v1014_v17  ;;  %v998_v15 = vadd.f32 %v966_v11, %v934_v5  ;;  %v999_v16 = vadd.f32 %v967_v12, %v935_v10  ;;  %1570 = vst [vmem:[%s2535_s9 + $0x50] sm:$0xff] %v1534_v6   ;;  %v1029_v21 = vmax.f32 %v997_v9, 0.0 }
 0x1e5   : > { %v920_v7 = vld [vmem:[#allocation2 + $0x70] sm:$0xff]  ;;  %v1524_v50 = vpack.c.bf16 %v1019_v38, %v1018_v37 }
 0x1e6   : > { %v984_v18 = vadd.f32 %v952_v13, %v920_v7  ;;  %1566 = vst [vmem:[%s2535_s9 + $0x30] sm:$0xff] %v1514_v36   ;;  %v1026_v7 = vmax.f32 %v994_v60, 0.0  ;;  %v1539_v13 = vpack.c.bf16 %v1025_v1, %v1024_v0  ;;  %v936_v17 = vld [vmem:[#allocation2 + $0xf0] sm:$0xff]  ;;  %v1030_v25 = vmax.f32 %v998_v15, 0.0 }
 0x1e7   : > { %v921_v8 = vld [vmem:[#allocation2 + $0x78] sm:$0xff]  ;;  %1568 = vst [vmem:[%s2535_s9 + $0x40] sm:$0xff] %v1524_v50   ;;  %v1031_v26 = vmax.f32 %v999_v16, 0.0 }
 0x1e8   : > { %v985_v19 = vadd.f32 %v953_v14, %v921_v8  ;;  %v1016_v30 = vmax.f32 %v984_v18, 0.0  ;;  %v996_v8 = vadd.f32 %v964_v3, %v932_v61  ;;  %v1027_v14 = vmax.f32 %v995_v2, 0.0  ;;  %v937_v18 = vld [vmem:[#allocation2 + $0xf8] sm:$0xff]  ;;  %1571 = vst [vmem:[%s2535_s9 + $0x58] sm:$0xff] %v1539_v13  }
 0x1e9   : > { %v1001_v27 = vadd.f32 %v969_v22, %v937_v18 }
 0x1ea   : > { %v1017_v31 = vmax.f32 %v985_v19, 0.0  ;;  %v968_v19 = vld [vmem:[%s2528_s1 + $0xf0] sm:$0xff]  ;;  %v1028_v20 = vmax.f32 %v996_v8, 0.0  ;;  %v1544_v24 = vpack.c.bf16 %v1027_v14, %v1026_v7 }
 0x1eb   : > { %v1000_v23 = vadd.f32 %v968_v19, %v936_v17 }
 0x1ec   : > { %v1519_v43 = vpack.c.bf16 %v1017_v31, %v1016_v30  ;;  %v1549_v28 = vpack.c.bf16 %v1029_v21, %v1028_v20  ;;  %1572 = vst [vmem:[%s2535_s9 + $0x60] sm:$0xff] %v1544_v24   ;;  %v1554_v30 = vpack.c.bf16 %v1031_v26, %v1030_v25  ;;  %v1033_v31 = vmax.f32 %v1001_v27, 0.0 }
 0x1ed   : > { %v1032_v29 = vmax.f32 %v1000_v23, 0.0 }
 0x1ee   : > { %1567 = vst [vmem:[%s2535_s9 + $0x38] sm:$0xff] %v1519_v43   ;;  %1573 = vst [vmem:[%s2535_s9 + $0x68] sm:$0xff] %v1549_v28  }
 0x1ef   : > { %1574 = vst [vmem:[%s2535_s9 + $0x70] sm:$0xff] %v1554_v30   ;;  %v1559_v32 = vpack.c.bf16 %v1033_v31, %v1032_v29 }
 0x1f1   : > { %1575 = vst [vmem:[%s2535_s9 + $0x78] sm:$0xff] %v1559_v32  }
 0x1f2 PF: > { %s2772_s21 = sld [smem:[#allocation15_spill]]  ;;  %s2773_s4 = sld [smem:[#allocation21_spill]] }
 0x1f3   : > { %s1208_s10 = sshll.u32 %s2535_s9, 4  ;;  %s1195_s6 = scalar_lea.sflag [#allocation5], %s2525_s17  ;;  %s2642_s10 = int_to_ptr.vmem [resolvable:$true] %s1208_s10 }
 0x1f4   : > { %s2002_s27 = scalar_lea.vmem %s2642_s10, 2048  ;;  %p2774_p5 = scmp.ne.s32.totalorder %s2763_s22, 0 }
 0x1f5   : > { %p2003_p7 = scmp.ne.s32.totalorder %s2642_s10, %s2002_s27  ;;  %s2167_s11 = smov [#allocation9]  }
 0x1f6   : > { %s2006_s29 = sshll.u32 %s2167_s11, 4  ;;  %s2007_s29 = int_to_ptr.vmem [resolvable:$false] %s2006_s29 }
 0x1f7   : > { %p2004_p6 = pnand %p2003_p7, %p2774_p5  ;;  %s2008_s28 = scalar_lea.vmem %s2007_s29, 4096 }
 0x1f8   : > { %s1480_s8 = sshll.u32 %s2772_s21, 11  ;;  %p2009_p0 = scmp.lt.s32.totalorder %s2642_s10, %s2007_s29 }
 0x1f9   : > { %s2639_s15 = scalar_lea.hbm %s2773_s4, %s1480_s8  ;;  %p2005_p11 = pneg %p2004_p6 }
 0x1fa   : > { %p2010_p1 = scmp.lt.s32.totalorder %s2008_s28, %s2002_s27 }
 0x1fc   : > { %p2011_p3 = por %p2010_p1, %p2009_p0 }
 0x1fe   : > { %p2012_p12 = pnand %p2011_p3, %p2005_p11 }
 0x200   : > { %2015 = shalt.err (!%p2012_p12)
}
 0x201   : > { %s2016_s7 = scalar_lea.hbm %s2639_s15, 2048  ;;  %s2020_s9 = scalar_lea.hbm %s2773_s4, 4096 }
 0x202   : > { %p2017_p9 = scmp.ne.s32.totalorder %s2639_s15, %s2016_s7  ;;  %p2021_p4 = scmp.lt.u32.totalorder %s2639_s15, %s2773_s4 }
 0x203   : > { %p2022_p2 = scmp.lt.u32.totalorder %s2020_s9, %s2016_s7  ;;  %p2024_p7 = scmp.lt.u32.totalorder %s2016_s7, %s2639_s15 }
 0x204   : > { %p2018_p10 = pnand %p2017_p9, %p2774_p5 }
 0x205   : > { %p2023_p13 = por %p2022_p2, %p2021_p4 }
 0x206   : > { %p2019_p8 = pneg %p2018_p10 }
 0x207   : > { %p2025_p6 = por %p2024_p7, %p2023_p13 }
 0x209   : > { %p2026_p11 = pnand %p2025_p6, %p2019_p8 }
 0x20b   : > { %2029 = shalt.err (!%p2026_p11)
}
 0x20c   : > { %s2168_s18 = smov 64   ;;  %s2169_s30 = smov 4  }
 0x20d   : > { %1710 = dma.vmem_to_hbm [thread:$0]  (%p2774_p5), %s2642_s10, 2048, %s2639_s15, %s1195_s6, %s2168_s18, %s2168_s18, %s2169_s30  }
 0x20e PF: > { %p1727_p0 = scmp.ge.s32.totalorder %s2156_s25, 2  ;;  %s1223_s27 = sand.u32 1, %s2104_s12  }
 0x20f   : > { %p2775_p1 = scmp.ne.s32.totalorder %s2764_s5, 0  ;;  %s1224_s11 = scalar_lea.sflag [#allocation5], %s1223_s27 }
 0x211   : > { %p1723_p3 = pnand %p1727_p0, %p2775_p1 }
 0x213   : > { %2099 = dma.done.wait (!%p1723_p3), %s1224_s11, 2048  }
 0x214   : > { %2101 = vsyncadd (!%p1723_p3), %s1224_s11, 4294965248  ;;  %s22_s25 = sadd.s32 1, %s2156_s25   ;;  %s2777_s22 = sld [smem:[#allocation14_spill]] }
 0x215   : > { %p2673_p12 = scmp.ge.s32.totalorder %s22_s25, 6   ;;  %s2778_s17 = sld [smem:[#allocation18_spill]] }
 0x216   : > { %s2779_s10 = sld [smem:[#allocation19_spill]]  ;;  %s2780_s5 = sld [smem:[#allocation16_spill]] }
 0x217   : > { %s2781_s6 = sld [smem:[#allocation17_spill]]  ;;  %s2782_s12 = smov %s2108_s13 }
 0x218   : > { %s2783_s13 = smov %s2112_s14  ;;  %s2784_s14 = smov %s2436_s3 }
 0x219   : > { %s2785_s15 = smov %s2120_s16  ;;  %s2787_s18 = smov %s2132_s19 }
 0x21a   : > { %s2786_s16 = smov %s2777_s22  ;;  %s2788_s19 = smov %s2136_s20 }
 0x21b   : > { %s2790_s21 = smov %s2148_s23  ;;  %s2791_s22 = smov %s2152_s24 }
 0x21c   : > { %s2789_s20 = smov %s2779_s10  ;;  %s2792_s23 = smov %s2780_s5 }
 0x21d   : > { %s2793_s24 = smov %s2781_s6  ;;  %21 = sbr.rel (!%p2673_p12) target bundleno = 15 (0xf), region = 109 }
 0x224   :  { %1229 = vsyncpa [#allocation4], 1 }
 0x225   :  { %1231 = vsyncpa [#allocation4 + $0x1], 1 }
 0x226   :  { %1232 = vsyncpa [#allocation7], 1 }
 0x227   :  { %1234 = vsyncpa [#allocation7 + $0x1], 1 }
 0x228   :  { %1235 = vsyncpa [#allocation5], 1 }
 0x229   :  { %1237 = vsyncpa [#allocation5 + $0x1], 1 }

</bundles_post_ra>
